<compile_context>
chip_gen: v7x
topology: tpu7x:2x2x1
jax: 0.10.0
libtpu: 0.0.40
codegen_flags: <defaults>
</compile_context>

<pallas_src>
import functools

import jax
import jax.numpy as jnp
from jax.experimental import pallas as pl
from jax.experimental.pallas import tpu as pltpu


def _round_up(n, m):
    return ((n + m - 1) // m) * m


def _actor_kernel(x_ref, w1_ref, b1_ref, w2_ref, b2_ref, w3_ref, b3_ref, o_ref,
                  *, compute_dtype):
    # Weights already arrive in compute_dtype (cast once wrapper-side); only
    # the streamed activation tile is cast here. Accumulate in f32
    # (preferred_element_type) and keep all elementwise work in f32.
    x = x_ref[...].astype(compute_dtype)

    # fc1 + ReLU
    h1 = jnp.dot(x, w1_ref[...], preferred_element_type=jnp.float32)
    h1 = jnp.maximum(h1 + b1_ref[...], 0.0)
    # fc2 + ReLU
    h2 = jnp.dot(h1.astype(compute_dtype), w2_ref[...],
                 preferred_element_type=jnp.float32)
    h2 = jnp.maximum(h2 + b2_ref[...], 0.0)
    # fc3
    logits = jnp.dot(h2.astype(compute_dtype), w3_ref[...],
                     preferred_element_type=jnp.float32)
    logits = logits + b3_ref[...]

    # Numerically stable softmax over the action axis; the divide is done as a
    # multiply by a reciprocal (frees VPU divide slots).
    m = jnp.max(logits, axis=-1, keepdims=True)
    e = jnp.exp(logits - m)
    denom = jnp.sum(e, axis=-1, keepdims=True)
    o_ref[...] = (e * pl.reciprocal(denom, approx=False)).astype(o_ref.dtype)


def actor_forward(x, params, *, tile_b=1024, compute_dtype=jnp.float32):
    """Batched Actor forward. x: [B, obs_size] f32 -> probs: [B, n_action] f32."""
    w1, b1, w2, b2, w3, b3 = params
    B, obs = x.shape
    h1_dim, h2_dim, n_action = w1.shape[1], w2.shape[1], w3.shape[1]

    # Cast weights once here (they stay VMEM-resident across grid steps, so an
    # in-kernel cast would be repeated every step). Biases stay f32.
    w1c = w1.astype(compute_dtype)
    w2c = w2.astype(compute_dtype)
    w3c = w3.astype(compute_dtype)

    # Batch tile: multiple of 8 sublanes, capped at tile_b. Pad the batch up to
    # a whole number of tiles; padded rows are sliced off after the call.
    tb = _round_up(min(tile_b, _round_up(B, 8)), 8)
    padded_b = _round_up(B, tb)
    if padded_b != B:
        x = jnp.pad(x, ((0, padded_b - B), (0, 0)))
    grid = (padded_b // tb,)

    # Activations stream tile-by-tile; weights/biases use constant index_maps
    # so they are copied into VMEM once and stay resident across grid steps.
    x_spec = pl.BlockSpec((tb, obs), lambda i: (i, 0))
    out_spec = pl.BlockSpec((tb, n_action), lambda i: (i, 0))

    def const_spec(p):
        return pl.BlockSpec(p.shape, lambda i: (0, 0))

    weight_bytes = sum(int(p.size) * p.dtype.itemsize
                       for p in (w1c, b1, w2c, b2, w3c, b3))
    flops = 2 * padded_b * (obs * h1_dim + h1_dim * h2_dim + h2_dim * n_action)
    bytes_accessed = (
        padded_b * obs * x.dtype.itemsize            # activations in
        + padded_b * n_action * 4                    # probs out
        + weight_bytes                               # weights/biases once
    )
    cost = pl.CostEstimate(
        flops=flops,
        transcendentals=padded_b * (n_action + 1),   # exp per logit + 1/denom
        bytes_accessed=bytes_accessed,
    )

    kernel = functools.partial(_actor_kernel, compute_dtype=compute_dtype)
    out = pl.pallas_call(
        kernel,
        out_shape=jax.ShapeDtypeStruct((padded_b, n_action), jnp.float32),
        grid=grid,
        in_specs=[x_spec,
                  const_spec(w1c), const_spec(b1),
                  const_spec(w2c), const_spec(b2),
                  const_spec(w3c), const_spec(b3)],
        out_specs=out_spec,
        compiler_params=pltpu.CompilerParams(
            dimension_semantics=("parallel",)),
        cost_estimate=cost,
    )(x, w1c, b1, w2c, b2, w3c, b3)
    return out[:B]


def init_actor_params(key, obs_size, n_action):
    """Deterministic init mirroring nn.Linear's U(-1/sqrt(fan_in), 1/sqrt(fan_in))."""
    def linear(key, fan_in, fan_out):
        kw, kb = jax.random.split(key)
        bound = 1.0 / jnp.sqrt(jnp.float32(fan_in))
        # stored as [in, out] (transposed vs. PyTorch) — see layout comment.
        w = jax.random.uniform(kw, (fan_in, fan_out), jnp.float32, -bound, bound)
        b = jax.random.uniform(kb, (1, fan_out), jnp.float32, -bound, bound)
        return w, b

    k1, k2, k3 = jax.random.split(key, 3)
    w1, b1 = linear(k1, obs_size, 64)
    w2, b2 = linear(k2, 64, 32)
    w3, b3 = linear(k3, 32, n_action)
    return (w1, b1, w2, b2, w3, b3)


def actor_forward_ref(x, params):
    """Plain-JAX reference for correctness checking."""
    w1, b1, w2, b2, w3, b3 = params
    h1 = jnp.maximum(x @ w1 + b1, 0.0)
    h2 = jnp.maximum(h1 @ w2 + b2, 0.0)
    logits = h2 @ w3 + b3
    return jax.nn.softmax(logits, axis=-1)


if __name__ == "__main__":
    key = jax.random.PRNGKey(0)
    k_params, k_x, k_big = jax.random.split(key, 3)

    obs_size = 16
    n_action = 8
    batch = 2

    params = init_actor_params(k_params, obs_size, n_action)

    # --- small batch (matches the original module's per-step usage) ---------
    x = jax.random.normal(k_x, (batch, obs_size), jnp.float32)
    probs = jax.block_until_ready(actor_forward(x, params))
    ref = actor_forward_ref(x, params)
    assert probs.shape == (batch, n_action)
    assert jnp.allclose(probs, ref, atol=1e-5, rtol=1e-5)
    assert jnp.allclose(jnp.sum(probs, axis=-1), 1.0, atol=1e-5)

    # --- large batch exercising the batch grid (4 tiles, pinned weights) ----
    xb = jax.random.normal(k_big, (1000, obs_size), jnp.float32)
    probs_b = jax.block_until_ready(actor_forward(xb, params, tile_b=256))
    ref_b = actor_forward_ref(xb, params)
    assert probs_b.shape == (1000, n_action)
    assert jnp.allclose(probs_b, ref_b, atol=1e-5, rtol=1e-5)
    assert jnp.allclose(jnp.sum(probs_b, axis=-1), 1.0, atol=1e-5)

    # --- bf16 MXU-input path (f32 accumulate/elementwise), relaxed tol ------
    probs_bf = jax.block_until_ready(
        actor_forward(xb, params, tile_b=256, compute_dtype=jnp.bfloat16))
    assert jnp.allclose(probs_bf, ref_b, atol=3e-2, rtol=3e-2)
    assert jnp.allclose(jnp.sum(probs_bf, axis=-1), 1.0, atol=1e-3)

    # TODO(synk): Categorical sampling in get_action() is host/JAX-side
    # (jax.random.categorical on the returned probs), not part of the kernel.
    print("KERNEL_OK")
</pallas_src>

<mosaic_0001>
module attributes {stable_mosaic.version = 11 : i64} {
  func.func @_actor_kernel(%arg0: i32, %arg1: memref<8x16xf32, #tpu.memory_space<vmem>>, %arg2: memref<16x64xf32, #tpu.memory_space<vmem>>, %arg3: memref<1x64xf32, #tpu.memory_space<vmem>>, %arg4: memref<64x32xf32, #tpu.memory_space<vmem>>, %arg5: memref<1x32xf32, #tpu.memory_space<vmem>>, %arg6: memref<32x8xf32, #tpu.memory_space<vmem>>, %arg7: memref<1x8xf32, #tpu.memory_space<vmem>>, %arg8: memref<8x8xf32, #tpu.memory_space<vmem>>) attributes {dimension_semantics = [#tpu.dimension_semantics<parallel>], iteration_bounds = array<i64: 1>, scalar_prefetch = 0 : i64, scratch_operands = 0 : i64, tpu.core_type = #tpu.core_type<tc>, window_params = [{transform_indices = @transform_0, window_bounds = array<i64: 8, 16>}, {pipeline_mode = #tpu.pipeline_mode<synchronous>, transform_indices = @transform_1, window_bounds = array<i64: 16, 64>}, {pipeline_mode = #tpu.pipeline_mode<synchronous>, transform_indices = @transform_2, window_bounds = array<i64: 1, 64>}, {pipeline_mode = #tpu.pipeline_mode<synchronous>, transform_indices = @transform_3, window_bounds = array<i64: 64, 32>}, {pipeline_mode = #tpu.pipeline_mode<synchronous>, transform_indices = @transform_4, window_bounds = array<i64: 1, 32>}, {pipeline_mode = #tpu.pipeline_mode<synchronous>, transform_indices = @transform_5, window_bounds = array<i64: 32, 8>}, {pipeline_mode = #tpu.pipeline_mode<synchronous>, transform_indices = @transform_6, window_bounds = array<i64: 1, 8>}, {transform_indices = @transform_7, window_bounds = array<i64: 8, 8>}]} {
    %c0 = arith.constant 0 : index
    %c0_0 = arith.constant 0 : index
    %0 = vector.load %arg1[%c0, %c0_0] : memref<8x16xf32, #tpu.memory_space<vmem>>, vector<8x16xf32>
    %c0_1 = arith.constant 0 : index
    %c0_2 = arith.constant 0 : index
    %1 = vector.load %arg2[%c0_1, %c0_2] : memref<16x64xf32, #tpu.memory_space<vmem>>, vector<16x64xf32>
    %cst = arith.constant dense<0.000000e+00> : vector<8x64xf32>
    %2 = tpu.matmul %0, %1, %cst {dimension_numbers = #tpu.dot_dimension_numbers<[1], [0], [0], [1], [0, 0, 1, 1], [], []>} : vector<8x16xf32>, vector<16x64xf32>, vector<8x64xf32> -> vector<8x64xf32>
    %c0_3 = arith.constant 0 : index
    %c0_4 = arith.constant 0 : index
    %3 = vector.load %arg3[%c0_3, %c0_4] : memref<1x64xf32, #tpu.memory_space<vmem>>, vector<1x64xf32>
    %4 = vector.broadcast %3 : vector<1x64xf32> to vector<8x64xf32>
    %5 = arith.addf %2, %4 : vector<8x64xf32>
    %cst_5 = arith.constant 0.000000e+00 : f32
    %6 = vector.broadcast %cst_5 : f32 to vector<8x64xf32>
    %7 = arith.maximumf %5, %6 : vector<8x64xf32>
    %c0_6 = arith.constant 0 : index
    %c0_7 = arith.constant 0 : index
    %8 = vector.load %arg4[%c0_6, %c0_7] : memref<64x32xf32, #tpu.memory_space<vmem>>, vector<64x32xf32>
    %cst_8 = arith.constant dense<0.000000e+00> : vector<8x32xf32>
    %9 = tpu.matmul %7, %8, %cst_8 {dimension_numbers = #tpu.dot_dimension_numbers<[1], [0], [0], [1], [0, 0, 1, 1], [], []>} : vector<8x64xf32>, vector<64x32xf32>, vector<8x32xf32> -> vector<8x32xf32>
    %c0_9 = arith.constant 0 : index
    %c0_10 = arith.constant 0 : index
    %10 = vector.load %arg5[%c0_9, %c0_10] : memref<1x32xf32, #tpu.memory_space<vmem>>, vector<1x32xf32>
    %11 = vector.broadcast %10 : vector<1x32xf32> to vector<8x32xf32>
    %12 = arith.addf %9, %11 : vector<8x32xf32>
    %cst_11 = arith.constant 0.000000e+00 : f32
    %13 = vector.broadcast %cst_11 : f32 to vector<8x32xf32>
    %14 = arith.maximumf %12, %13 : vector<8x32xf32>
    %c0_12 = arith.constant 0 : index
    %c0_13 = arith.constant 0 : index
    %15 = vector.load %arg6[%c0_12, %c0_13] : memref<32x8xf32, #tpu.memory_space<vmem>>, vector<32x8xf32>
    %cst_14 = arith.constant dense<0.000000e+00> : vector<8x8xf32>
    %16 = tpu.matmul %14, %15, %cst_14 {dimension_numbers = #tpu.dot_dimension_numbers<[1], [0], [0], [1], [0, 0, 1, 1], [], []>} : vector<8x32xf32>, vector<32x8xf32>, vector<8x8xf32> -> vector<8x8xf32>
    %c0_15 = arith.constant 0 : index
    %c0_16 = arith.constant 0 : index
    %17 = vector.load %arg7[%c0_15, %c0_16] : memref<1x8xf32, #tpu.memory_space<vmem>>, vector<1x8xf32>
    %18 = vector.broadcast %17 : vector<1x8xf32> to vector<8x8xf32>
    %19 = arith.addf %16, %18 : vector<8x8xf32>
    %cst_17 = arith.constant dense<0xFF800000> : vector<8xf32>
    %20 = vector.multi_reduction <maximumf>, %19, %cst_17 [1] : vector<8x8xf32> to vector<8xf32>
    %21 = vector.shape_cast %20 : vector<8xf32> to vector<8x1xf32>
    %22 = vector.broadcast %21 : vector<8x1xf32> to vector<8x8xf32>
    %23 = arith.subf %19, %22 : vector<8x8xf32>
    %24 = math.exp %23 : vector<8x8xf32>
    %cst_18 = arith.constant dense<0.000000e+00> : vector<8xf32>
    %25 = vector.multi_reduction <add>, %24, %cst_18 [1] : vector<8x8xf32> to vector<8xf32>
    %26 = vector.shape_cast %25 : vector<8xf32> to vector<8x1xf32>
    %27 = tpu.reciprocal %26 : vector<8x1xf32> -> vector<8x1xf32>
    %28 = vector.broadcast %27 : vector<8x1xf32> to vector<8x8xf32>
    %29 = arith.mulf %24, %28 : vector<8x8xf32>
    %c0_19 = arith.constant 0 : index
    %c0_20 = arith.constant 0 : index
    %30 = vector.load %arg8[%c0_19, %c0_20] : memref<8x8xf32, #tpu.memory_space<vmem>>, vector<8x8xf32>
    tpu.vector_store %arg8[%c0_19, %c0_20], %29 {strides = array<i32>} : memref<8x8xf32, #tpu.memory_space<vmem>>, vector<8x8xf32>,
    return
  }
  func.func @transform_0(%arg0: i32) -> (i32, i32) {
    %c0_i32 = arith.constant 0 : i32
    %c0_i32_0 = arith.constant 0 : i32
    return %arg0, %c0_i32 : i32, i32
  }
  func.func @transform_1(%arg0: i32) -> (i32, i32) {
    %c0_i32 = arith.constant 0 : i32
    %c0_i32_0 = arith.constant 0 : i32
    %c0_i32_1 = arith.constant 0 : i32
    return %c0_i32, %c0_i32_0 : i32, i32
  }
  func.func @transform_2(%arg0: i32) -> (i32, i32) {
    %c0_i32 = arith.constant 0 : i32
    %c0_i32_0 = arith.constant 0 : i32
    %c0_i32_1 = arith.constant 0 : i32
    return %c0_i32, %c0_i32_0 : i32, i32
  }
  func.func @transform_3(%arg0: i32) -> (i32, i32) {
    %c0_i32 = arith.constant 0 : i32
    %c0_i32_0 = arith.constant 0 : i32
    %c0_i32_1 = arith.constant 0 : i32
    return %c0_i32, %c0_i32_0 : i32, i32
  }
  func.func @transform_4(%arg0: i32) -> (i32, i32) {
    %c0_i32 = arith.constant 0 : i32
    %c0_i32_0 = arith.constant 0 : i32
    %c0_i32_1 = arith.constant 0 : i32
    return %c0_i32, %c0_i32_0 : i32, i32
  }
  func.func @transform_5(%arg0: i32) -> (i32, i32) {
    %c0_i32 = arith.constant 0 : i32
    %c0_i32_0 = arith.constant 0 : i32
    %c0_i32_1 = arith.constant 0 : i32
    return %c0_i32, %c0_i32_0 : i32, i32
  }
  func.func @transform_6(%arg0: i32) -> (i32, i32) {
    %c0_i32 = arith.constant 0 : i32
    %c0_i32_0 = arith.constant 0 : i32
    %c0_i32_1 = arith.constant 0 : i32
    return %c0_i32, %c0_i32_0 : i32, i32
  }
  func.func @transform_7(%arg0: i32) -> (i32, i32) {
    %c0_i32 = arith.constant 0 : i32
    %c0_i32_0 = arith.constant 0 : i32
    return %arg0, %c0_i32 : i32, i32
  }
}

</mosaic_0001>

<bundles_post_ra>
// kernel: tpu_custom_call.1
= control target key start
LH: loop header
LB: loop body
LE: loop exit
PB: predicated region body
PF: predicated region fallthrough
CT: control target
= control target key end

     0   :  { %v427_v2 = vmov 0.0|0.0   ;;  %vm428_vm0 = vmmov 0   ;;  %v429_v4 = vmov 0.0   ;;  %vm37_vm1 = vcmask 130048   ;;  %s543_s0 = inlined_call_operand.vmem [shape: f32[8,16], index: 0, kind: input, shape index: {}]   ;;  %s544_s1 = inlined_call_operand.vmem [shape: f32[16,64], index: 1, kind: input, shape index: {}]   ;;  %s545_s2 = inlined_call_operand.vmem [shape: f32[1,64], index: 2, kind: input, shape index: {}]   ;;  %s546_s3 = inlined_call_operand.vmem [shape: f32[64,32], index: 3, kind: input, shape index: {}]   ;;  %s547_s4 = inlined_call_operand.vmem [shape: f32[1,32], index: 4, kind: input, shape index: {}]   ;;  %s548_s5 = inlined_call_operand.vmem [shape: f32[32,8], index: 5, kind: input, shape index: {}]   ;;  %s549_s6 = inlined_call_operand.vmem [shape: f32[1,8], index: 6, kind: input, shape index: {}]   ;;  %s550_s7 = inlined_call_operand.hbm [shape: f32[8,8], index: 7, kind: output, shape index: {}]  }
   0x1   :  { %v28_v0 = vld [vmem:[%s544_s1] sm:$0xff]  ;;  %v29_v1 = vld [vmem:[%s544_s1 + $0x8] sm:$0xff]  ;;  %374 = vmatprep.subr.bf16.mxu0 %v427_v2  ;;  %341 = vmatprep.mubr.msk.f32.mxu0 %vm428_vm0, %v429_v4  ;;  %v114_v7 = vld [vmem:[%s546_s3 + $0x10] sm:$0xff] }
   0x2   :  { %v375_v3 = vpack.c.bf16 %v29_v1, %v28_v0  ;;  %v112_v5 = vld [vmem:[%s546_s3] sm:$0xff]  ;;  %v113_v6 = vld [vmem:[%s546_s3 + $0x8] sm:$0xff]  ;;  %377 = vmatprep.subr.bf16.mxu1 %v427_v2  ;;  %v115_v9 = vld [vmem:[%s546_s3 + $0x18] sm:$0xff]  ;;  %360 = vmatprep.mubr.msk.f32.mxu1 %vm428_vm0, %v429_v4 }
   0x3   :  { %v378_v8 = vpack.c.bf16 %v113_v6, %v112_v5  ;;  %v27_v10 = vld [vmem:[%s543_s0] sm:$0xff] }
   0x4   :  { %376 = vmatpush3.bf16.msra.mxu0 %v375_v3 }
   0x5   :  { %12 = vsyncpa [#allocation3], 0  ;;  %379 = vmatpush3.bf16.msra.mxu1 %v378_v8  ;;  %v381_v11 = vpack.c.bf16 %v115_v9, %v114_v7  ;;  %389 = vmatprep.subr.bf16.mxu0 %v427_v2  ;;  %v116_v12 = vld [vmem:[%s546_s3 + $0x20] sm:$0xff]  ;;  %v117_v13 = vld [vmem:[%s546_s3 + $0x28] sm:$0xff]  ;;  %vm127_vm2 = vcmask 523264   ;;  %vm213_vm3 = vcmask 261120  }
   0x6   :  { %380 = vmatprep.subr.bf16.mxu1 %v427_v2  ;;  %v384_v14 = vpack.c.bf16 %v117_v13, %v116_v12  ;;  %v118_v15 = vld [vmem:[%s546_s3 + $0x30] sm:$0xff]  ;;  %v119_v16 = vld [vmem:[%s546_s3 + $0x38] sm:$0xff]  ;;  %v202_v18 = vld [vmem:[%s548_s5] sm:$0xff]  ;;  %vm287_vm4 = vcmask 64512  }
   0x7   :  { %342 = vmatmul.mubr.msk.f32.vlgmr.msra.gmra.mrb[0].mxu0 %vm37_vm1, %v27_v10  ;;  %v387_v17 = vpack.c.bf16 %v119_v16, %v118_v15  ;;  %v203_v19 = vld [vmem:[%s548_s5 + $0x8] sm:$0xff]  ;;  %v314_v21 = vld [vmem:[%s545_s2] ss:$0 sm:$0xff]  ;;  %v204_v26 = vld [vmem:[%s548_s5 + $0x10] sm:$0xff] }
   0x8   :  { %371 = vmatprep.mubr.msk.f32.mxu0 %vm428_vm0, %v429_v4  ;;  %v390_v20 = vpack.c.bf16 %v203_v19, %v202_v18  ;;  %v205_v27 = vld [vmem:[%s548_s5 + $0x18] sm:$0xff]  ;;  %v316_v29 = vld [vmem:[%s547_s4] ss:$0 sm:$0xff]  ;;  %s430_s4 = smov [#allocation2]  }
   0x9   :  { %382 = vmatpush3.bf16.msra.mxu1 %v381_v11  ;;  %v393_v28 = vpack.c.bf16 %v205_v27, %v204_v26  ;;  %v318_v34 = vld [vmem:[%s549_s6] ss:$0 sm:$0xff]  ;;  %s306_s5 = sshll.u32 %s430_s4, 4  ;;  %s307_s5 = int_to_ptr.vmem [resolvable:$true] %s306_s5 }
   0xa   :  { %383 = vmatprep.subr.bf16.mxu1 %v427_v2  ;;  %391 = vmatpush3.bf16.msra.mxu0 %v390_v20  ;;  %s403_s6 = scalar_lea.vmem %s307_s5, 128  ;;  %p408_p1 = scmp.lt.s32.totalorder %s307_s5, %s307_s5 }
   0xb   :  { %392 = vmatprep.subr.bf16.mxu0 %v427_v2  ;;  %p404_p0 = scmp.ne.s32.totalorder %s307_s5, %s403_s6  ;;  %p409_p2 = scmp.lt.s32.totalorder %s403_s6, %s403_s6 }
   0xd   :  { %385 = vmatpush3.bf16.msra.mxu1 %v384_v14  ;;  %p410_p3 = por %p409_p2, %p408_p1 }
   0xe   :  { %386 = vmatprep.subr.bf16.mxu1 %v427_v2  ;;  %394 = vmatpush3.bf16.msra.mxu0 %v393_v28 }
   0xf   :  { %p411_p4 = pnand %p410_p3, %p404_p0 }
  0x11   :  { %388 = vmatpush3.bf16.msra.mxu1 %v387_v17 }
  0xda   :  { %v107_v22 = vpop.f32.mrb[0].mxu0 }
  0xdb   :  { %v108_v23 = vadd.f32 %v314_v21, %v107_v22  ;;  %v343_v24 = vpop.f32.mrb[1].mxu0 }
  0xdd   :  { %v111_v25 = vmax.f32 %v108_v23, 0.0 }
  0xdf   :  { %361 = vmatmul.mubr.msk.f32.vlgmr.msra.gmra.mrb[0].mxu1 %vm127_vm2, %v111_v25 }
 0x1b2   :  { %v197_v30 = vpop.f32.mrb[0].mxu1 }
 0x1b3   :  { %v198_v31 = vadd.f32 %v316_v29, %v197_v30  ;;  %v362_v32 = vpop.f32.mrb[1].mxu1 }
 0x1b5   :  { %v201_v33 = vmax.f32 %v198_v31, 0.0 }
 0x1b7   :  { %372 = vmatmul.mubr.msk.f32.vlgmr.msra.gmra.mrb[2].mxu0 %vm213_vm3, %v201_v33 }
 0x28a   :  { %v283_v35 = vpop.f32.mrb[2].mxu0 }
 0x28b   :  { %v284_v36 = vadd.f32 %v318_v34, %v283_v35  ;;  %v373_v37 = vpop.f32.mrb[3].mxu0 }
 0x28d   :  { %v288_v38 = vsel %vm287_vm4, %v284_v36, -inf }
 0x28e   :  { %289 = vmax.xlane.f32.xlu0 %v288_v38 }
 0x31b   :  { %v290_v39 = vpop.xlane.xlu0 %289 }
 0x31c   :  { %v291_v40 = vsub.f32 %v284_v36, %v290_v39 }
 0x31e   :  { %v292_v41 = vmul.f32 1.442695, %v291_v40 }
 0x320   :  { %399 = vpow2.f32 %v292_v41 }
 0x32a   :  { %v400_v42 = vpop.eup %399 }
 0x32b   :  { %v294_v43 = vsel %vm287_vm4, %v400_v42, 0.0 }
 0x32c   :  { %295 = vadd.xlane.f32.xlu0 %v294_v43 }
 0x3b9   :  { %v296_v44 = vpop.xlane.xlu0 %295 }
 0x3ba   :  { %401 = vrcp.f32 %v296_v44 }
 0x3c4   :  { %v402_v45 = vpop.eup %401 }
 0x3c5   :  { %v298_v46 = vmul.f32 %v402_v45, %v400_v42 }
 0x3c7   :  { %299 = vst.msk [vmem:[#allocation2] sm:$0xff] %vm287_vm4, %v298_v46 }
 0x3c8   :  { %414 = shalt.err (!%p411_p4)
}
 0x3c9   :  { %s415_s11 = scalar_lea.hbm %s550_s7, 128 }
 0x3ca   :  { %p416_p5 = scmp.ne.s32.totalorder %s550_s7, %s415_s11  ;;  %p419_p6 = scmp.lt.u32.totalorder %s415_s11, %s550_s7 }
 0x3cc   :  { %p421_p7 = pnand %p419_p6, %p416_p5 }
 0x3ce   :  { %424 = shalt.err (!%p421_p7)
}
 0x3cf   :  { %309 = dma.vmem_to_hbm [thread:$0]  %s307_s5, 128, %s550_s7, [#allocation3]  }
 0x3d0   :  { %425 = dma.done.wait [#allocation3], 128  }
 0x3d1   :  { %426 = vsyncadd [#allocation3], 4294967168 }
 0x3d2   :  { %313 = vsyncpa [#allocation3], 1 }

</bundles_post_ra>
